<compile_context>
chip_gen: v5e
topology: v5e:2x2
jax: 0.10.0
libtpu: 0.0.40
codegen_flags: <defaults>
</compile_context>

<pallas_src>
import functools

import jax
import jax.numpy as jnp
from jax import lax
from jax.experimental import pallas as pl
from jax.experimental.pallas import tpu as pltpu

# --- loss hyper-parameters (match the PyTorch module defaults) ---------------
ALPHA_FOCAL = 0.01
GAMMA_FOCAL = 2          # fixed to 2 -> implemented as x*x
DELTA_A = 0.1
DELTA_R = 1.0
EMB_ALPHA = 1.0
EMB_BETA = 1.0
EMB_GAMMA = 0.001


# =============================================================================
# VMEM budgeting / tile selection
# =============================================================================
def _round_up(x, m):
    return ((x + m - 1) // m) * m


def _physical_vmem_bytes():
    try:
        info = pltpu.get_tpu_info()
        cap = getattr(info, "vmem_capacity_bytes", None)
        if cap:
            return int(cap)
    except Exception:
        pass
    return 64 * 1024 * 1024          # conservative default = v7x per-core VMEM


def _vmem_limit_bytes():
    # ~75% of physical VMEM: keeps headroom for Mosaic scratch on v7x (64 MiB)
    # while letting v5e/v6e (128 MiB) run the largest tiles.
    return min(int(_physical_vmem_bytes() * 3 // 4), 96 * 1024 * 1024)


def _tile_budget_bytes():
    # fraction of the limit reserved for the double-buffered blocks + temps
    return max(2 * 1024 * 1024, _vmem_limit_bytes() // 4)


def _pick_tile(n, max_tile, granularity):
    """Largest multiple of `granularity` that divides n and is <= max_tile;
    falls back to the full dimension (always legal for BlockSpec)."""
    if n <= granularity or n % granularity != 0:
        return n
    t = min(max_tile, n)
    t -= t % granularity
    while t > granularity and n % t != 0:
        t -= granularity
    return t if (t > 0 and n % t == 0) else n


def _budgeted_pixel_tile(hw, per_pixel_bytes):
    tp_max = max(128, _tile_budget_bytes() // max(per_pixel_bytes, 1))
    return _pick_tile(hw, tp_max, 128)


# =============================================================================
# Kernel 1: weighted 2D cross-entropy (CrossEntropyLoss2d)
#   grid = (B parallel, pixel-tiles arbitrary); per-batch partial loss / class
#   counts accumulate directly in the resident output blocks; final divide in
#   the wrapper (tiny).
# =============================================================================
def _sem_ce_kernel(logits_ref, tgt_ref, w_ref, loss_ref, counts_ref):
    t = pl.program_id(1)

    @pl.when(t == 0)
    def _init():
        loss_ref[...] = jnp.zeros_like(loss_ref)
        counts_ref[...] = jnp.zeros_like(counts_ref)

    logits = logits_ref[0].astype(jnp.float32)     # (C, TP) pixels on lanes
    tgt = tgt_ref[0]                               # (1, TP) i32
    w = w_ref[...]                                 # (C, 1)  f32

    # numerically-stable log-softmax over the class (sublane) axis
    m = jnp.max(logits, axis=0, keepdims=True)                              # (1,TP)
    lse = jnp.log(jnp.sum(jnp.exp(logits - m), axis=0, keepdims=True)) + m  # (1,TP)

    class_ids = lax.broadcasted_iota(jnp.int32, logits.shape, 0)            # (C,TP)
    onehot = (class_ids == tgt).astype(jnp.float32)                         # (C,TP)
    logit_t = jnp.sum(onehot * logits, axis=0, keepdims=True)               # (1,TP)
    w_t = jnp.sum(onehot * w, axis=0, keepdims=True)                        # (1,TP)

    per_pixel = w_t * (lse - logit_t)                                       # weighted CE
    tile_counts = jnp.sum(onehot, axis=1, keepdims=True)                    # (C,1)

    loss_ref[...] = loss_ref[...] + jnp.sum(per_pixel)
    counts_ref[...] = counts_ref[...] + tile_counts[None]                   # (1,C,1)


def semantic_ce_loss(logits_nchw, target, weights):
    B, C, H, W = logits_nchw.shape
    HW = H * W
    logits = logits_nchw.reshape(B, C, HW)                    # keep model dtype
    tgt = target.reshape(B, 1, HW).astype(jnp.int32)
    w = jnp.asarray(weights, jnp.float32).reshape(C, 1)

    isz = logits.dtype.itemsize
    per_px = 2 * (C * isz + 4) + 40 * _round_up(C, 8) + 256   # bufs + f32 temps
    TP = _budgeted_pixel_tile(HW, per_px)
    nt = HW // TP

    loss_b, counts_b = pl.pallas_call(
        _sem_ce_kernel,
        out_shape=(jax.ShapeDtypeStruct((B, 1, 1), jnp.float32),
                   jax.ShapeDtypeStruct((B, C, 1), jnp.float32)),
        grid_spec=pltpu.PrefetchScalarGridSpec(
            num_scalar_prefetch=0,
            grid=(B, nt),
            in_specs=[pl.BlockSpec((1, C, TP), lambda b, t: (b, 0, t)),
                      pl.BlockSpec((1, 1, TP), lambda b, t: (b, 0, t)),
                      pl.BlockSpec((C, 1), lambda b, t: (0, 0))],
            out_specs=(pl.BlockSpec((1, 1, 1), lambda b, t: (b, 0, 0)),
                       pl.BlockSpec((1, C, 1), lambda b, t: (b, 0, 0)))),
        compiler_params=pltpu.CompilerParams(
            dimension_semantics=("parallel", "arbitrary"),
            vmem_limit_bytes=_vmem_limit_bytes()),
    )(logits, tgt, w)

    # tiny wrapper-side reduction over the batch (B*C values)
    counts = jnp.sum(counts_b[:, :, 0], axis=0)                # (C,)
    divisor = jnp.maximum(jnp.sum(counts * w[:, 0]), 1e-5)
    loss = jnp.sum(loss_b) / divisor
    return loss, counts.astype(jnp.int32), divisor


# =============================================================================
# Kernel 2: BinaryFocalLoss
#   lane-dense (rows, 128*k) layout, per-row-chunk partial sums on a fully
#   parallel grid; wrapper sums the handful of partials.
# =============================================================================
def _focal_kernel(o_ref, t_ref, out_ref):
    o = o_ref[...].astype(jnp.float32)              # (TR, L)
    t = t_ref[...].astype(jnp.float32)              # (TR, L)
    pos = t != 0.0
    sel = jnp.where(pos, o, 1.0 - o)
    coef = jnp.where(pos, ALPHA_FOCAL, 1.0 - ALPHA_FOCAL)
    one_m = 1.0 - sel
    term = -coef * one_m * one_m * jnp.log(jnp.maximum(sel, 1e-4))   # gamma = 2
    out_ref[0, 0, 0] = jnp.sum(term)


def _lane_dense_shape(n, max_lanes=2048):
    top = min(max_lanes, n)
    top -= top % 128
    for lanes in range(top, 127, -128):
        if n % lanes == 0:
            return n // lanes, lanes
    return None


def focal_loss(center_output, center_target):
    o = center_output.reshape(-1)
    t = center_target.reshape(-1)
    n = o.shape[0]
    shp = _lane_dense_shape(n)
    if shp is None:                                  # N not a multiple of 128
        lanes = center_output.shape[-1]
        shp = (n // lanes, lanes)
    R, L = shp
    o2 = o.reshape(R, L)
    t2 = t.reshape(R, L)

    isz = o2.dtype.itemsize + t2.dtype.itemsize
    per_row = (2 * isz + 40) * L                     # double-buffered inputs + temps
    TR = _pick_tile(R, max(8, _tile_budget_bytes() // per_row), 8)
    nr = R // TR

    partials = pl.pallas_call(
        _focal_kernel,
        out_shape=jax.ShapeDtypeStruct((nr, 1, 1), jnp.float32),
        grid_spec=pltpu.PrefetchScalarGridSpec(
            num_scalar_prefetch=0,
            grid=(nr,),
            in_specs=[pl.BlockSpec((TR, L), lambda i: (i, 0)),
                      pl.BlockSpec((TR, L), lambda i: (i, 0))],
            out_specs=pl.BlockSpec((1, 1, 1), lambda i: (i, 0, 0))),
        compiler_params=pltpu.CompilerParams(
            dimension_semantics=("parallel",),
            vmem_limit_bytes=_vmem_limit_bytes()),
    )(o2, t2)
    return jnp.sum(partials)


# =============================================================================
# Kernel 3: ComposedHingedLoss per-image partial sums
#   attraction: one MXU matmul per pixel tile (||c-e||^2 expansion); per-center
#   hinged sums / counts in VMEM scratch.  Repelling / regularization computed
#   once per image at the final tile via a (K,K) Gram matmul.
# =============================================================================
def _embedding_kernel(emb_ref, tgt_ref, centers_ref, ids_ref,
                      attr_ref, rep_ref, reg_ref, s_sc, n_sc, *, num_centers):
    t = pl.program_id(1)

    @pl.when(t == 0)
    def _init():
        s_sc[...] = jnp.zeros_like(s_sc)
        n_sc[...] = jnp.zeros_like(n_sc)

    emb = emb_ref[0].astype(jnp.float32)               # (E, TP)
    tgt = tgt_ref[0]                                   # (1, TP) i32
    cmat = centers_ref[0].astype(jnp.float32)          # (K, E)
    cids = ids_ref[0]                                  # (K, 1)  i32

    # ||c - e||^2 = ||c||^2 + ||e||^2 - 2 c.e  (MXU for the cross term)
    ce = jnp.dot(cmat, emb, preferred_element_type=jnp.float32)    # (K, TP)
    c_sq = jnp.sum(cmat * cmat, axis=1, keepdims=True)             # (K, 1)
    e_sq = jnp.sum(emb * emb, axis=0, keepdims=True)               # (1, TP)
    # per-center sqrt kept (not collapsed over K): stays exact even when two
    # centers share an instance id (only matters for large K on the EUP).
    dist = jnp.sqrt(jnp.maximum(c_sq + e_sq - 2.0 * ce, 0.0))      # (K, TP)
    hinged = jnp.maximum(dist - DELTA_A, 0.0)
    mask = tgt == cids                                             # (K, TP)
    s_sc[...] = s_sc[...] + jnp.sum(jnp.where(mask, hinged, 0.0),
                                    axis=1, keepdims=True)
    n_sc[...] = n_sc[...] + jnp.sum(mask.astype(jnp.float32),
                                    axis=1, keepdims=True)

    @pl.when(t == pl.num_programs(1) - 1)
    def _finalize():
        n = n_sc[...]                                              # (K, 1)
        denom = jnp.where(n > 1.0, n - 1.0, jnp.maximum(n, 1.0))
        attr_ref[0, 0, 0] = jnp.sum(s_sc[...] / denom)

        # repelling: (K,K) Gram matmul, hinge off-diagonal (the reference's
        # self-term relu(delta_r - 0) - delta_r cancels exactly).
        gram = lax.dot_general(cmat, cmat, (((1,), (1,)), ((), ())),
                               preferred_element_type=jnp.float32)  # (K, K)
        row = lax.broadcasted_iota(jnp.int32, (num_centers, num_centers), 0)
        col = lax.broadcasted_iota(jnp.int32, (num_centers, num_centers), 1)
        csq_row = jnp.sum(jnp.where(row == col, gram, 0.0),
                          axis=0, keepdims=True)                   # (1, K)
        d2 = jnp.maximum(c_sq + csq_row - 2.0 * gram, 0.0)          # (K, K)
        hinged_r = jnp.maximum(DELTA_R - jnp.sqrt(d2), 0.0)
        rep_ref[0, 0, 0] = jnp.sum(jnp.where(row == col, 0.0, hinged_r))

        reg_ref[0, 0, 0] = jnp.sum(jnp.sqrt(c_sq))                  # sum ||c_k||


def embedding_partial_losses(emb_nchw, instance_target, center_coordinates):
    B, E, H, W = emb_nchw.shape
    HW = H * W
    K = center_coordinates.shape[1]

    emb = emb_nchw.reshape(B, E, HW)                               # keep dtype
    tgt = instance_target.reshape(B, 1, HW).astype(jnp.int32)

    # tiny O(B*K*E) gather of per-image center embeddings / instance ids (glue)
    ys = center_coordinates[..., 0].astype(jnp.int32)              # (B, K)
    xs = center_coordinates[..., 1].astype(jnp.int32)
    flat = ys * W + xs                                             # (B, K)
    centers_emb = jnp.transpose(
        jnp.take_along_axis(emb, flat[:, None, :], axis=2), (0, 2, 1))  # (B, K, E)
    center_ids = jnp.take_along_axis(
        instance_target.reshape(B, HW).astype(jnp.int32), flat, axis=1
    ).reshape(B, K, 1)                                             # (B, K, 1)

    isz = emb.dtype.itemsize
    per_px = (2 * (E * isz + 4) + 20 * _round_up(max(K, 1), 8)
              + 12 * _round_up(E, 8) + 256)
    TP = _budgeted_pixel_tile(HW, per_px)
    nt = HW // TP

    kernel = functools.partial(_embedding_kernel, num_centers=K)
    attr, rep, reg = pl.pallas_call(
        kernel,
        out_shape=(jax.ShapeDtypeStruct((B, 1, 1), jnp.float32),) * 3,
        grid_spec=pltpu.PrefetchScalarGridSpec(
            num_scalar_prefetch=0,
            grid=(B, nt),
            in_specs=[pl.BlockSpec((1, E, TP), lambda b, t: (b, 0, t)),
                      pl.BlockSpec((1, 1, TP), lambda b, t: (b, 0, t)),
                      pl.BlockSpec((1, K, E), lambda b, t: (b, 0, 0)),
                      pl.BlockSpec((1, K, 1), lambda b, t: (b, 0, 0))],
            out_specs=(pl.BlockSpec((1, 1, 1), lambda b, t: (b, 0, 0)),
                       pl.BlockSpec((1, 1, 1), lambda b, t: (b, 0, 0)),
                       pl.BlockSpec((1, 1, 1), lambda b, t: (b, 0, 0))),
            scratch_shapes=[pltpu.VMEM((K, 1), jnp.float32),
                            pltpu.VMEM((K, 1), jnp.float32)]),
        compiler_params=pltpu.CompilerParams(
            dimension_semantics=("parallel", "arbitrary"),
            vmem_limit_bytes=_vmem_limit_bytes()),
    )(emb, tgt, centers_emb, center_ids)
    return attr[:, 0, 0], rep[:, 0, 0], reg[:, 0, 0]


# =============================================================================
# PanopticLoss wrapper (the cross-batch recursive divisions of the reference
# code are scalar bookkeeping and done here exactly as written).
# =============================================================================
class PanopticLossPallas:
    def __init__(self, weighting, batch_size):
        self.weighting = jnp.asarray(weighting, jnp.float32)
        self.batch_size = batch_size

    def __call__(self, output, semantic_target, center_target,
                 instance_target, center_coordinates):
        semantic_output, center_output, embedding_output = output

        sem_loss, counts, divisor = semantic_ce_loss(
            semantic_output, semantic_target[0], self.weighting)
        cen_loss = focal_loss(center_output, center_target)
        attr_b, rep_b, reg_b = embedding_partial_losses(
            embedding_output, instance_target, center_coordinates)

        # NOTE: the reference divides the *cumulative* value after each image.
        K = int(center_coordinates.shape[1])
        A = jnp.float32(0.0)
        R = jnp.float32(0.0)
        G = jnp.float32(0.0)
        for i in range(self.batch_size):
            A = A + attr_b[i]
            if K >= 1:
                A = A / K
            if K > 1:
                R = (R + rep_b[i]) / (K * (K - 1))
            G = G + reg_b[i]
            if K > 0:
                G = G / K

        emb_loss = EMB_ALPHA * A + EMB_BETA * R + EMB_GAMMA * G
        return (cen_loss, sem_loss, emb_loss, A, R, counts, divisor)


# =============================================================================
if __name__ == "__main__":
    key = jax.random.PRNGKey(0)
    B, C, H, W, E, K = 2, 4, 16, 16, 8, 3   # batch, classes, spatial, embed-dim, centers

    keys = jax.random.split(key, 8)
    semantic_output = jax.random.normal(keys[0], (B, C, H, W), jnp.float32)
    center_output = jax.nn.sigmoid(jax.random.normal(keys[1], (B, 1, H, W), jnp.float32))
    embedding_output = jax.random.normal(keys[2], (B, E, H, W), jnp.float32)

    semantic_target = jax.random.randint(keys[3], (B, H, W), 0, C, jnp.int32)
    center_target = (jax.random.uniform(keys[4], (B, H, W)) < 0.05).astype(jnp.float32)
    instance_target = jax.random.randint(keys[5], (B, H, W), 0, 5, jnp.int32)
    ys = jax.random.randint(keys[6], (B, K), 0, H, jnp.int32)
    xs = jax.random.randint(keys[7], (B, K), 0, W, jnp.int32)
    center_coordinates = jnp.stack([ys, xs], axis=-1)          # (B, K, 2)

    weighting = [1.0, 2.0, 0.5, 1.5]
    loss_fn = PanopticLossPallas(weighting, batch_size=B)

    results = loss_fn(
        (semantic_output, center_output, embedding_output),
        [semantic_target],       # module indexes semantic_target[0]
        center_target,
        instance_target,
        center_coordinates,
    )
    results = jax.block_until_ready(results)
    print("KERNEL_OK")
</pallas_src>

<mosaic_0001>
module attributes {stable_mosaic.version = 11 : i64} {
  func.func @_sem_ce_kernel(%arg0: i32, %arg1: i32, %arg2: memref<1x4x256xf32, #tpu.memory_space<vmem>>, %arg3: memref<1x1x256xi32, #tpu.memory_space<vmem>>, %arg4: memref<4x1xf32, #tpu.memory_space<vmem>>, %arg5: memref<1x1x1xf32, #tpu.memory_space<vmem>>, %arg6: memref<1x4x1xf32, #tpu.memory_space<vmem>>) attributes {dimension_semantics = [#tpu.dimension_semantics<parallel>, #tpu.dimension_semantics<arbitrary>], iteration_bounds = array<i64: 2, 1>, scalar_prefetch = 0 : i64, scratch_operands = 0 : i64, tpu.core_type = #tpu.core_type<tc>, window_params = [{transform_indices = @transform_0, window_bounds = array<i64: 1, 4, 256>}, {transform_indices = @transform_1, window_bounds = array<i64: 1, 1, 256>}, {pipeline_mode = #tpu.pipeline_mode<synchronous>, transform_indices = @transform_2, window_bounds = array<i64: 4, 1>}, {transform_indices = @transform_3, window_bounds = array<i64: 1, 1, 1>}, {transform_indices = @transform_4, window_bounds = array<i64: 1, 4, 1>}]} {
    %c0_i32 = arith.constant 0 : i32
    %0 = arith.cmpi eq, %arg1, %c0_i32 : i32
    %1 = arith.extui %0 : i1 to i32
    %c0_i32_0 = arith.constant 0 : i32
    %2 = arith.cmpi ne, %1, %c0_i32_0 : i32
    scf.if %2 {
      %cst_25 = arith.constant 0.000000e+00 : f32
      %45 = vector.broadcast %cst_25 : f32 to vector<1x1x1xf32>
      %c0_26 = arith.constant 0 : index
      %c0_27 = arith.constant 0 : index
      %c0_28 = arith.constant 0 : index
      %46 = vector.load %arg5[%c0_26, %c0_27, %c0_28] : memref<1x1x1xf32, #tpu.memory_space<vmem>>, vector<1x1x1xf32>
      tpu.vector_store %arg5[%c0_26, %c0_27, %c0_28], %45 {strides = array<i32>} : memref<1x1x1xf32, #tpu.memory_space<vmem>>, vector<1x1x1xf32>,
      %cst_29 = arith.constant 0.000000e+00 : f32
      %47 = vector.broadcast %cst_29 : f32 to vector<1x4x1xf32>
      %c0_30 = arith.constant 0 : index
      %c0_31 = arith.constant 0 : index
      %c0_32 = arith.constant 0 : index
      %48 = vector.load %arg6[%c0_30, %c0_31, %c0_32] : memref<1x4x1xf32, #tpu.memory_space<vmem>>, vector<1x4x1xf32>
      tpu.vector_store %arg6[%c0_30, %c0_31, %c0_32], %47 {strides = array<i32>} : memref<1x4x1xf32, #tpu.memory_space<vmem>>, vector<1x4x1xf32>,
    } else {
    }
    %c0 = arith.constant 0 : index
    %c0_1 = arith.constant 0 : index
    %c0_2 = arith.constant 0 : index
    %3 = vector.load %arg2[%c0, %c0_1, %c0_2] : memref<1x4x256xf32, #tpu.memory_space<vmem>>, vector<1x4x256xf32>
    %4 = vector.shape_cast %3 : vector<1x4x256xf32> to vector<4x256xf32>
    %c0_3 = arith.constant 0 : index
    %c0_4 = arith.constant 0 : index
    %c0_5 = arith.constant 0 : index
    %5 = vector.load %arg3[%c0_3, %c0_4, %c0_5] : memref<1x1x256xi32, #tpu.memory_space<vmem>>, vector<1x1x256xi32>
    %6 = vector.shape_cast %5 : vector<1x1x256xi32> to vector<1x256xi32>
    %c0_6 = arith.constant 0 : index
    %c0_7 = arith.constant 0 : index
    %7 = vector.load %arg4[%c0_6, %c0_7] : memref<4x1xf32, #tpu.memory_space<vmem>>, vector<4x1xf32>
    %cst = arith.constant dense<0xFF800000> : vector<256xf32>
    %8 = vector.multi_reduction <maximumf>, %4, %cst [0] : vector<4x256xf32> to vector<256xf32>
    %9 = vector.shape_cast %8 : vector<256xf32> to vector<1x256xf32>
    %10 = vector.broadcast %9 : vector<1x256xf32> to vector<4x256xf32>
    %11 = arith.subf %4, %10 : vector<4x256xf32>
    %12 = math.exp %11 : vector<4x256xf32>
    %cst_8 = arith.constant dense<0.000000e+00> : vector<256xf32>
    %13 = vector.multi_reduction <add>, %12, %cst_8 [0] : vector<4x256xf32> to vector<256xf32>
    %14 = vector.shape_cast %13 : vector<256xf32> to vector<1x256xf32>
    %15 = math.log %14 : vector<1x256xf32>
    %16 = arith.addf %15, %9 : vector<1x256xf32>
    %17 = tpu.iota {dimensions = array<i32: 0>} : vector<4x256xi32>
    %18 = vector.broadcast %6 : vector<1x256xi32> to vector<4x256xi32>
    %19 = arith.cmpi eq, %17, %18 : vector<4x256xi32>
    %20 = arith.extui %19 : vector<4x256xi1> to vector<4x256xi32>
    %21 = arith.sitofp %20 : vector<4x256xi32> to vector<4x256xf32>
    %22 = arith.mulf %21, %4 : vector<4x256xf32>
    %cst_9 = arith.constant dense<0.000000e+00> : vector<256xf32>
    %23 = vector.multi_reduction <add>, %22, %cst_9 [0] : vector<4x256xf32> to vector<256xf32>
    %24 = vector.shape_cast %23 : vector<256xf32> to vector<1x256xf32>
    %25 = vector.broadcast %7 : vector<4x1xf32> to vector<4x256xf32>
    %26 = arith.mulf %21, %25 : vector<4x256xf32>
    %cst_10 = arith.constant dense<0.000000e+00> : vector<256xf32>
    %27 = vector.multi_reduction <add>, %26, %cst_10 [0] : vector<4x256xf32> to vector<256xf32>
    %28 = vector.shape_cast %27 : vector<256xf32> to vector<1x256xf32>
    %29 = arith.subf %16, %24 : vector<1x256xf32>
    %30 = arith.mulf %28, %29 : vector<1x256xf32>
    %cst_11 = arith.constant dense<0.000000e+00> : vector<4xf32>
    %31 = vector.multi_reduction <add>, %21, %cst_11 [1] : vector<4x256xf32> to vector<4xf32>
    %32 = vector.shape_cast %31 : vector<4xf32> to vector<4x1xf32>
    %c0_12 = arith.constant 0 : index
    %c0_13 = arith.constant 0 : index
    %c0_14 = arith.constant 0 : index
    %33 = vector.load %arg5[%c0_12, %c0_13, %c0_14] : memref<1x1x1xf32, #tpu.memory_space<vmem>>, vector<1x1x1xf32>
    %34 = vector.shape_cast %30 : vector<1x256xf32> to vector<1x1x256xf32>
    %cst_15 = arith.constant dense<0.000000e+00> : vector<1xf32>
    %35 = vector.multi_reduction <add>, %34, %cst_15 [1, 2] : vector<1x1x256xf32> to vector<1xf32>
    %36 = vector.shape_cast %35 : vector<1xf32> to vector<1x1x1xf32>
    %37 = vector.extract %36[0, 0, 0] : f32 from vector<1x1x1xf32>
    %38 = vector.broadcast %37 : f32 to vector<1x1x1xf32>
    %39 = arith.addf %33, %38 : vector<1x1x1xf32>
    %c0_16 = arith.constant 0 : index
    %c0_17 = arith.constant 0 : index
    %c0_18 = arith.constant 0 : index
    %40 = vector.load %arg5[%c0_16, %c0_17, %c0_18] : memref<1x1x1xf32, #tpu.memory_space<vmem>>, vector<1x1x1xf32>
    tpu.vector_store %arg5[%c0_16, %c0_17, %c0_18], %39 {strides = array<i32>} : memref<1x1x1xf32, #tpu.memory_space<vmem>>, vector<1x1x1xf32>,
    %c0_19 = arith.constant 0 : index
    %c0_20 = arith.constant 0 : index
    %c0_21 = arith.constant 0 : index
    %41 = vector.load %arg6[%c0_19, %c0_20, %c0_21] : memref<1x4x1xf32, #tpu.memory_space<vmem>>, vector<1x4x1xf32>
    %42 = vector.shape_cast %32 : vector<4x1xf32> to vector<1x4x1xf32>
    %43 = arith.addf %41, %42 : vector<1x4x1xf32>
    %c0_22 = arith.constant 0 : index
    %c0_23 = arith.constant 0 : index
    %c0_24 = arith.constant 0 : index
    %44 = vector.load %arg6[%c0_22, %c0_23, %c0_24] : memref<1x4x1xf32, #tpu.memory_space<vmem>>, vector<1x4x1xf32>
    tpu.vector_store %arg6[%c0_22, %c0_23, %c0_24], %43 {strides = array<i32>} : memref<1x4x1xf32, #tpu.memory_space<vmem>>, vector<1x4x1xf32>,
    return
  }
  func.func @transform_0(%arg0: i32, %arg1: i32) -> (i32, i32, i32) {
    %c0_i32 = arith.constant 0 : i32
    %c0_i32_0 = arith.constant 0 : i32
    return %arg0, %c0_i32, %arg1 : i32, i32, i32
  }
  func.func @transform_1(%arg0: i32, %arg1: i32) -> (i32, i32, i32) {
    %c0_i32 = arith.constant 0 : i32
    %c0_i32_0 = arith.constant 0 : i32
    return %arg0, %c0_i32, %arg1 : i32, i32, i32
  }
  func.func @transform_2(%arg0: i32, %arg1: i32) -> (i32, i32) {
    %c0_i32 = arith.constant 0 : i32
    %c0_i32_0 = arith.constant 0 : i32
    %c0_i32_1 = arith.constant 0 : i32
    return %c0_i32, %c0_i32_0 : i32, i32
  }
  func.func @transform_3(%arg0: i32, %arg1: i32) -> (i32, i32, i32) {
    %c0_i32 = arith.constant 0 : i32
    %c0_i32_0 = arith.constant 0 : i32
    %c0_i32_1 = arith.constant 0 : i32
    return %arg0, %c0_i32, %c0_i32_0 : i32, i32, i32
  }
  func.func @transform_4(%arg0: i32, %arg1: i32) -> (i32, i32, i32) {
    %c0_i32 = arith.constant 0 : i32
    %c0_i32_0 = arith.constant 0 : i32
    %c0_i32_1 = arith.constant 0 : i32
    return %arg0, %c0_i32, %c0_i32_0 : i32, i32, i32
  }
}

</mosaic_0001>

<bundles_post_ra>
// kernel: tpu_custom_call.1
= control target key start
LH: loop header
LB: loop body
LE: loop exit
PB: predicated region body
PF: predicated region fallthrough
CT: control target
= control target key end

     0   :  { %10 = vsyncpa [#allocation3], 0  ;;  %s858_s0 = inlined_call_operand.hbm [shape: f32[2,4,256], index: 0, kind: input, shape index: {}]   ;;  %s859_s1 = inlined_call_operand.vmem [shape: s32[2,1,256], index: 1, kind: input, shape index: {}]   ;;  %s860_s2 = inlined_call_operand.vmem [shape: f32[4,1], index: 2, kind: input, shape index: {}]   ;;  %s861_s3 = inlined_call_operand.vmem [shape: f32[2,1,1], index: 3, kind: output, shape index: {0}]   ;;  %s862_s4 = inlined_call_operand.vmem [shape: f32[2,4,1], index: 4, kind: output, shape index: {1}]  }
   0x1   :  { %12 = vsyncpa [#allocation3 + $0x1], 0  ;;  %s731_s15 = smov 0   ;;  %s733_s16 = smov 0  }
   0x2   :  { %s735_s17 = smov 0   ;;  %s737_s18 = smov 0  }
   0x3   :  { %s739_s19 = smov 0   ;;  %s741_s20 = smov 0  }
   0x4 LB: > { %s540_s21 = sadd.s32 4294967295, %s702_s20   ;;  %s30_s22 = sadd.s32 1, %s698_s19  ;;  %s702_s20 = sphi %s741_s20, %s18_s20   ;;  %s698_s19 = sphi %s739_s19, %s869_s19   ;;  %s694_s18 = sphi %s737_s18, %s868_s18   ;;  %s690_s17 = sphi %s735_s17, %s867_s17   ;;  %s686_s16 = sphi %s733_s16, %s866_s16   ;;  %s682_s15 = sphi %s731_s15, %s865_s15  }
   0x5   : > { %p32_p0 = scmp.ge.s32.totalorder %s30_s22, 2  ;;  %s39_s23 = sadd.s32 1, %s690_s17 }
   0x6   : > { %p46_p1 = scmp.ne.s32.totalorder %s690_s17, %s686_s16  ;;  %p47_p2 = scmp.eq.s32.totalorder %s702_s20, 0 }
   0x7   : > { %s871_s22 = smov (%p32_p0, %s30_s22), 0  ;;  %p52_p4 = scmp.ne.s32.totalorder %s686_s16, %s682_s15 }
   0x8   : > { %p767_p3 = por %p47_p2, %p46_p1  ;;  %s34_s25 = ssub.s32 %s698_s19, %s871_s22 }
   0x9   : > { %p53_p5 = scmp.eq.s32.totalorder %s540_s21, 0  ;;  %p37_p6 = scmp.eq.s32.totalorder %s34_s25, 0 }
   0xa   : > { %p564_p8 = scmp.lt.s32.totalorder %s702_s20, 2  ;;  %s180_s28 = sand.u32 1, %s690_s17  }
   0xb   : > { %p774_p7 = por %p53_p5, %p52_p4  ;;  %s555_s29 = sshll.u32 %s698_s19, 3 }
   0xc   : > { %s780_s27 = scalar_select %p37_p6, %s690_s17, %s39_s23  }
   0xd   : > { %s544_s30 = sshll.u32 %s180_s28, 3  ;;  %s191_s7 = scalar_lea.hbm %s858_s0, %s555_s29 }
   0xe   : > { %s193_s8 = sshll.u32 %s191_s7, 4  ;;  %s184_s9 = scalar_lea.vmem [#allocation2], %s544_s30  ;;  %s194_s8 = int_to_ptr.hbm [resolvable:$true] %s193_s8 }
   0xf   : > { %s195_s10 = sshll.u32 %s184_s9, 4  ;;  %p561_p9 = pnand %p564_p8, %p767_p3  ;;  %s196_s10 = int_to_ptr.vmem [resolvable:$true] %s195_s10 }
  0x10   : > { %p547_p10 = scmp.ge.s32.totalorder %s702_s20, 1  ;;  %p212_p11 = scmp.lt.s32.totalorder %s702_s20, 3 }
  0x11   : > { %s181_s11 = scalar_lea.sflag [#allocation3], %s180_s28 }
  0x12   : > { %563 = dma.hbm_to_vmem [thread:$0]  (!%p561_p9), %s194_s8, 128, %s196_s10, %s181_s11  }
  0x13   : > { %p213_p12 = pnand %p547_p10, %p212_p11 }
  0x14   : > { %s218_s12 = sand.u32 (!%p213_p12), 1, %s686_s16  }
  0x15   : > { %216 = sbr.rel (%p213_p12) target bundleno = 346 (0x15a), region = 32  ;;  %s548_s13 = sshll.u32 (!%p213_p12), %s218_s12, 3 }
  0x16   : > { %s219_s14 = scalar_lea.sflag (!%p213_p12), [#allocation3], %s218_s12  ;;  %s222_s15 = scalar_lea.vmem (!%p213_p12), [#allocation2], %s548_s13 }
  0x1a   : > { %677 = dma.done.wait (%p774_p7), %s219_s14, 128  }
  0x1b   : > { %679 = vsyncadd (%p774_p7), %s219_s14, 4294967168  ;;  %v704_v0 = vmov 0   ;;  %v285_v1 = vld [vmem:[%s860_s2] sm:$0xf]  ;;  %v283_v2 = vld [vmem:[%s222_s15] sm:$0xff]  ;;  %vm292_vm0 = vcmask 1043456   ;;  %v341_v26 = vlaneseq }
  0x1c   : > { %615 = vset.pattern.permute.xlu0 %v704_v0  ;;  %287 = vst [vmem:[#allocation1] ss:$2 sm:$0xff] %v283_v2  ;;  %p260_p13 = scmp.lt.s32.totalorder %s694_s18, 1  ;;  %v705_v37 = vmov 0.0   ;;  %vm403_vm3 = vcmask 1040384   ;;  %vm279_vm4 = vcmask 0  }
  0x1d   : > { %374 = vperm.xlu0 %615, %v285_v1   ;;  %v342_v30 = vshrl.u32 %v341_v26, 7  ;;  %vm281_vm5 = vcmask 3072  }
  0x1e   : > { %s873_s18 = smov (!%p260_p13, %s694_s18), 1 }
  0x1f   : > { %s549_s24 = sshll.u32 %s873_s18, 1  ;;  %s270_s5 = scalar_lea.vmem %s861_s3, %s873_s18 }
  0x20   : > { %s266_s28 = scalar_lea.vmem %s859_s1, %s549_s24  ;;  %280 = vst.msk [vmem:[%s270_s5] sm:$0x1] %vm279_vm4, %v705_v37  ;;  %s550_s6 = sshll.u32 %s873_s18, 2 }
  0x21   : > { %v284_v27 = vld [vmem:[%s266_s28] sm:$0x3]  ;;  %s274_s9 = scalar_lea.vmem %s862_s4, %s550_s6 }
  0x22   : > { %v343_v31 = vperm.slane %v284_v27, 0  ;;  %v344_v33 = vperm.slane %v284_v27, 1  ;;  %282 = vst.msk [vmem:[%s274_s9] sm:$0xf] %vm281_vm5, %v705_v37 }
  0x23   : > { %v289_v3 = vld.sshfl [vmem:[#allocation1 + $0x8] sm:$0xff pattern:$0x75316420]  ;;  %v288_v5 = vld.sshfl [vmem:[#allocation1] sm:$0xff pattern:$0x75316420] }
  0x24   : > { %v300_v4 = vsel %vm292_vm0, %v289_v3, -inf  ;;  %v293_v7 = vsel %vm292_vm0, %v288_v5, -inf  ;;  %vm345_vm1 = vcmp.eq.s32.totalorder %v342_v30, %v343_v31  ;;  %vm346_vm2 = vcmp.eq.s32.totalorder %v342_v30, %v344_v33 }
  0x25   : > { %v301_v6 = vrot.slane %v300_v4, 4  ;;  %v294_v8 = vrot.slane %v293_v7, 4  ;;  %v551_v38 = vsel %vm345_vm1, 1.0, %v705_v37  ;;  %v552_v40 = vsel %vm346_vm2, 1.0, %v705_v37 }
  0x26   : > { %v397_v54 = vsel %vm292_vm0, %v551_v38, 0.0  ;;  %v398_v55 = vsel %vm292_vm0, %v552_v40, 0.0 }
  0x27   : > { %v302_v9 = vmax.f32 %v300_v4, %v301_v6  ;;  %v295_v10 = vmax.f32 %v293_v7, %v294_v8  ;;  %v399_v57 = vadd.f32 %v398_v55, %v397_v54 }
  0x29   : > { %v303_v11 = vrot.slane %v302_v9, 2  ;;  %v296_v12 = vrot.slane %v295_v10, 2  ;;  %400 = vadd.xlane.f32.xlu1 %v399_v57 }
  0x2b   : > { %v304_v13 = vmax.f32 %v302_v9, %v303_v11  ;;  %v297_v14 = vmax.f32 %v295_v10, %v296_v12 }
  0x2d   : > { %v305_v15 = vrot.slane %v304_v13, 1  ;;  %v298_v16 = vrot.slane %v297_v14, 1 }
  0x2f   : > { %v801_v17 = vmax.f32 %v304_v13, %v305_v15  ;;  %v803_v18 = vmax.f32 %v297_v14, %v298_v16 }
  0x31   : > { %v309_v19 = vrot.slane %v801_v17, 4 }
  0x33   : > { %v310_v20 = vsel %vm292_vm0, %v803_v18, %v309_v19 }
  0x34   : > { %v312_v21 = vsub.f32 %v283_v2, %v310_v20 }
  0x36   : > { %v313_v22 = vmul.f32 1.442695, %v312_v21 }
  0x38   : > { %616 = vpow2.f32 %v313_v22 }
  0x3e   : > { %v617_v23 = vpop.eup %616 }
  0x3f   : > { %316 = vst [vmem:[#allocation1] ss:$2 sm:$0xff] %v617_v23 }
  0x46   : > { %v317_v24 = vld.sshfl [vmem:[#allocation1] sm:$0xff pattern:$0x75316420]  ;;  %v318_v25 = vld.sshfl [vmem:[#allocation1 + $0x8] sm:$0xff pattern:$0x75316420] }
  0x47   : > { %351 = vst [vmem:[#allocation1] ss:$2 sm:$0xff] %v283_v2  ;;  %v321_v28 = vsel %vm292_vm0, %v317_v24, 0.0  ;;  %v328_v29 = vsel %vm292_vm0, %v318_v25, 0.0 }
  0x48   : > { %v322_v32 = vrot.slane %v321_v28, 4  ;;  %v329_v34 = vrot.slane %v328_v29, 4 }
  0x4a   : > { %v323_v35 = vadd.f32 %v322_v32, %v321_v28  ;;  %v330_v36 = vadd.f32 %v329_v34, %v328_v29 }
  0x4c   : > { %v324_v42 = vrot.slane %v323_v35, 2  ;;  %v331_v43 = vrot.slane %v330_v36, 2 }
  0x4e   : > { %v352_v39 = vld.sshfl [vmem:[#allocation1] sm:$0xff pattern:$0x75316420]  ;;  %v353_v41 = vld.sshfl [vmem:[#allocation1 + $0x8] sm:$0xff pattern:$0x75316420]  ;;  %v325_v46 = vadd.f32 %v324_v42, %v323_v35  ;;  %v332_v47 = vadd.f32 %v331_v43, %v330_v36 }
  0x4f   : > { %v356_v44 = vmul.f32 %v551_v38, %v352_v39  ;;  %v357_v45 = vmul.f32 %v552_v40, %v353_v41 }
  0x50   : > { %v326_v50 = vrot.slane %v325_v46, 1  ;;  %v333_v52 = vrot.slane %v332_v47, 1 }
  0x51   : > { %v358_v48 = vsel %vm292_vm0, %v356_v44, 0.0  ;;  %v365_v49 = vsel %vm292_vm0, %v357_v45, 0.0  ;;  %v420_v44 = vld [vmem:[%s274_s9] sm:$0xf] }
  0x52   : > { %v359_v51 = vrot.slane %v358_v48, 4  ;;  %v366_v53 = vrot.slane %v365_v49, 4  ;;  %v327_v56 = vadd.f32 %v326_v50, %v325_v46  ;;  %v334_v59 = vadd.f32 %v333_v52, %v332_v47  ;;  %v402_v46 = vld [vmem:[%s270_s5] sm:$0x1] }
  0x54   : > { %v360_v58 = vadd.f32 %v359_v51, %v358_v48  ;;  %v367_v60 = vadd.f32 %v366_v53, %v365_v49  ;;  %618 = vlog2.f32 %v327_v56 }
  0x55   : > { %620 = vlog2.f32 %v334_v59 }
  0x56   : > { %v361_v61 = vrot.slane %v360_v58, 2  ;;  %v368_v62 = vrot.slane %v367_v60, 2 }
  0x58   : > { %v362_v63 = vadd.f32 %v361_v61, %v360_v58  ;;  %v369_v2 = vadd.f32 %v368_v62, %v367_v60 }
  0x5a   : > { %v619_v0 = vpop.eup %618  ;;  %v363_v9 = vrot.slane %v362_v63, 1  ;;  %v370_v13 = vrot.slane %v369_v2, 1 }
  0x5b   : > { %v621_v3 = vpop.eup %620  ;;  %v336_v8 = vmul.f32 0.6931472, %v619_v0 }
  0x5c   : > { %v338_v12 = vmul.f32 0.6931472, %v621_v3  ;;  %v364_v19 = vadd.f32 %v363_v9, %v362_v63  ;;  %v371_v23 = vadd.f32 %v370_v13, %v369_v2 }
  0x5d   : > { %v339_v16 = vadd.f32 %v336_v8, %v803_v18 }
  0x5e   : > { %v340_v22 = vadd.f32 %v338_v12, %v801_v17 }
  0x5f   : > { %v393_v28 = vsub.f32 %v339_v16, %v364_v19 }
  0x60   : > { %v394_v29 = vsub.f32 %v340_v22, %v371_v23 }
  0x8f   : > { %v375_v1 = vpop.permute.xlu0 %374 }
  0x90   : > { %v377_v4 = vmul.f32 %v551_v38, %v375_v1  ;;  %v378_v5 = vmul.f32 %v552_v40, %v375_v1 }
  0x92   : > { %v379_v6 = vsel %vm292_vm0, %v377_v4, 0.0  ;;  %v386_v7 = vsel %vm292_vm0, %v378_v5, 0.0 }
  0x93   : > { %v380_v10 = vrot.slane %v379_v6, 4  ;;  %v387_v11 = vrot.slane %v386_v7, 4 }
  0x95   : > { %v381_v14 = vadd.f32 %v380_v10, %v379_v6  ;;  %v388_v15 = vadd.f32 %v387_v11, %v386_v7 }
  0x97   : > { %v382_v20 = vrot.slane %v381_v14, 2  ;;  %v389_v21 = vrot.slane %v388_v15, 2 }
  0x99   : > { %v383_v24 = vadd.f32 %v382_v20, %v381_v14  ;;  %v390_v25 = vadd.f32 %v389_v21, %v388_v15 }
  0x9b   : > { %v384_v26 = vrot.slane %v383_v24, 1  ;;  %v391_v27 = vrot.slane %v390_v25, 1 }
  0x9c   : > { %v401_v43 = vpop.xlane.xlu1 %400 }
  0x9d   : > { %v385_v30 = vadd.f32 %v384_v26, %v383_v24  ;;  %v392_v31 = vadd.f32 %v391_v27, %v390_v25  ;;  %v421_v45 = vadd.f32 %v420_v44, %v401_v43 }
  0x9f   : > { %v395_v32 = vmul.f32 %v393_v28, %v385_v30  ;;  %v396_v33 = vmul.f32 %v394_v29, %v392_v31  ;;  %423 = vst.msk [vmem:[%s274_s9] sm:$0xf] %vm281_vm5, %v421_v45 }
  0xa1   : > { %v404_v18 = vsel %vm403_vm3, %v395_v32, 0.0  ;;  %v405_v34 = vsel %vm403_vm3, %v396_v33, 0.0 }
  0xa2   : > { %v406_v35 = vadd.f32 %v405_v34, %v404_v18 }
  0xa4   : > { %407 = vadd.xlane.f32.xlu0 %v406_v35 }
 0x117   : > { %v408_v17 = vpop.xlane.xlu0 %407 }
 0x118   : > { %v409_v36 = vrot.slane %v408_v17, 4 }
 0x11a   : > { %v410_v38 = vadd.f32 %v409_v36, %v408_v17 }
 0x11c   : > { %v411_v39 = vrot.slane %v410_v38, 2 }
 0x11e   : > { %v412_v40 = vadd.f32 %v411_v39, %v410_v38 }
 0x120   : > { %v413_v41 = vrot.slane %v412_v40, 1 }
 0x122   : > { %v414_v42 = vadd.f32 %v413_v41, %v412_v40 }
 0x124   : > { %556 = vpush %v414_v42 }
 0x155   : > { %s557_s10 = spop %556 }
 0x156   : > { %v416_v47 = vstv %s557_s10 }
 0x157   : > { %v417_v48 = vadd.f32 %v416_v47, %v402_v46 }
 0x159   : > { %419 = vst.msk [vmem:[%s270_s5] sm:$0x1] %vm279_vm4, %v417_v48 }
 0x15a PF: > { %s18_s20 = sadd.s32 1, %s702_s20   ;;  %s865_s15 = smov %s686_s16 }
 0x15b   : > { %p15_p0 = scmp.ge.s32.totalorder %s18_s20, 4   ;;  %s866_s16 = smov %s690_s17 }
 0x15c   : > { %s867_s17 = smov %s780_s27  ;;  %s868_s18 = smov %s698_s19 }
 0x15d   : > { %s869_s19 = smov %s871_s22  ;;  %17 = sbr.rel (!%p15_p0) target bundleno = 4 (0x4), region = 91 }
 0x162   :  { %455 = vsyncpa [#allocation3], 1 }
 0x163   :  { %457 = vsyncpa [#allocation3 + $0x1], 1 }

</bundles_post_ra>
